<compile_context>
chip_gen: v5e
topology: v5e:2x2
jax: 0.10.0
libtpu: 0.0.40
codegen_flags: <defaults>
</compile_context>

<pallas_src>
import functools
import math

import jax
import jax.numpy as jnp
from jax import lax
from jax.experimental import pallas as pl
from jax.experimental.pallas import tpu as pltpu


def _transformer_block_kernel(x_ref, wq_ref, wk_ref, wv_ref, wout_ref, bout_ref,
                              w1_ref, b1_ref, w2_ref, b2_ref, o_ref,
                              *, bb, seq, heads, dim_head, scale, mm_dtype):
    rb = bb * seq                       # rows in this block (Bb batch elements)
    d = x_ref.shape[-1]

    xf = x_ref[...]                     # (rb, d) f32
    xm = xf.astype(mm_dtype)            # matmul operand dtype (f32 or bf16)
    inv_sqrt2 = 1.0 / math.sqrt(2.0)

    # ---------------- Attention ----------------
    attn_acc = jnp.zeros((rb, d), jnp.float32)
    for h in range(heads):              # small static head count; ops batched over bb
        q = jnp.dot(xm, wq_ref[h], preferred_element_type=jnp.float32)   # (rb, dh)
        k = jnp.dot(xm, wk_ref[h], preferred_element_type=jnp.float32)
        v = jnp.dot(xm, wv_ref[h], preferred_element_type=jnp.float32)

        # leading-dim split only (layout-trivial): (rb, dh) -> (bb, seq, dh)
        q3 = q.reshape(bb, seq, dim_head).astype(mm_dtype)
        k3 = k.reshape(bb, seq, dim_head).astype(mm_dtype)
        v3 = v.reshape(bb, seq, dim_head).astype(mm_dtype)

        # scores: contract last dims, single leading batch dim (no explicit .T)
        dots = jnp.einsum("bnd,bmd->bnm", q3, k3,
                          preferred_element_type=jnp.float32) * scale    # (bb, seq, seq)
        dots = dots - jnp.max(dots, axis=-1, keepdims=True)
        p = jnp.exp(dots)
        denom = jnp.sum(p, axis=-1, keepdims=True)
        attn = p * pl.reciprocal(denom, approx=True)                     # EUP reciprocal

        ctx = jnp.einsum("bnm,bmd->bnd", attn.astype(mm_dtype), v3,
                         preferred_element_type=jnp.float32)             # (bb, seq, dh)
        ctx2 = ctx.reshape(rb, dim_head).astype(mm_dtype)

        # accumulate output projection per head (== concat + (inner, D) matmul)
        attn_acc = attn_acc + jnp.dot(ctx2, wout_ref[h],
                                      preferred_element_type=jnp.float32)

    x1 = attn_acc + bout_ref[...] + xf                                   # residual 1 (f32)

    # ---------------- FeedForward ----------------
    h1 = jnp.dot(x1.astype(mm_dtype), w1_ref[...],
                 preferred_element_type=jnp.float32) + b1_ref[...]
    g = 0.5 * h1 * (1.0 + lax.erf(h1 * inv_sqrt2))                       # exact GELU, f32
    y = jnp.dot(g.astype(mm_dtype), w2_ref[...],
                preferred_element_type=jnp.float32) + b2_ref[...]

    o_ref[...] = (y + x1).astype(o_ref.dtype)                            # residual 2


def transformer_block(x, params, *, heads, dim_head,
                      mm_dtype=jnp.float32, batch_block=None):
    B, N, D = x.shape
    inner = heads * dim_head
    mlp = params["w1"].shape[1]
    scale = dim_head ** (-0.5)

    # Pick a batch block (divisor of B): as many batch elements per grid step as a
    # modest activation budget allows -> bigger MXU tiles, amortised step overhead.
    if batch_block is None:
        budget = 4 * 1024 * 1024
        per_b = 4 * N * (3 * inner + heads * N + inner + 2 * D + mlp + 2 * D)
        bb = max(1, min(B, budget // max(per_b, 1)))
        while B % bb:
            bb -= 1
    else:
        bb = batch_block
    assert B % bb == 0
    nb = B // bb
    rb = bb * N

    kernel = functools.partial(_transformer_block_kernel, bb=bb, seq=N,
                               heads=heads, dim_head=dim_head, scale=scale,
                               mm_dtype=mm_dtype)

    # Flatten rows for the projection/FF matmuls; reshape back in the wrapper.
    xf = x.reshape(B * N, D)

    # MXU operands may be bf16 (v6e/v7x); biases stay f32 (added to f32 accumulators).
    wq = params["wq"].astype(mm_dtype)
    wk = params["wk"].astype(mm_dtype)
    wv = params["wv"].astype(mm_dtype)
    wout = params["wout"].astype(mm_dtype)
    w1 = params["w1"].astype(mm_dtype)
    w2 = params["w2"].astype(mm_dtype)

    def const_spec(shape):
        return pl.BlockSpec(shape, lambda i, _n=len(shape): (0,) * _n)

    flops = (2 * B * N * 3 * D * inner          # q/k/v projections
             + 4 * B * heads * N * N * dim_head  # scores + attn@v
             + 2 * B * N * inner * D             # output projection
             + 4 * B * N * D * mlp)              # feed-forward
    transcendentals = B * heads * N * N + B * N * mlp
    bytes_accessed = (4 * 2 * B * N * D
                      + sum(int(a.size) * a.dtype.itemsize
                            for a in (wq, wk, wv, wout, w1, w2))
                      + 4 * (2 * D + mlp))

    out = pl.pallas_call(
        kernel,
        out_shape=jax.ShapeDtypeStruct((B * N, D), x.dtype),
        grid=(nb,),
        in_specs=[
            pl.BlockSpec((rb, D), lambda i: (i, 0)),      # x rows (bb*N per step)
            const_spec((heads, D, dim_head)),             # Wq  (per head)
            const_spec((heads, D, dim_head)),             # Wk
            const_spec((heads, D, dim_head)),             # Wv
            const_spec((heads, dim_head, D)),             # Wout (per head)
            const_spec((1, D)),                           # b_out
            const_spec((D, mlp)),                         # W1
            const_spec((1, mlp)),                         # b1
            const_spec((mlp, D)),                         # W2
            const_spec((1, D)),                           # b2
        ],
        out_specs=pl.BlockSpec((rb, D), lambda i: (i, 0)),
        compiler_params=pltpu.CompilerParams(
            dimension_semantics=("parallel",),
            vmem_limit_bytes=32 * 1024 * 1024),
        cost_estimate=pl.CostEstimate(flops=flops,
                                      transcendentals=transcendentals,
                                      bytes_accessed=bytes_accessed),
    )(xf, wq, wk, wv, wout, params["bout"], w1, params["b1"], w2, params["b2"])

    return out.reshape(B, N, D)


def init_params(key, dim, heads, dim_head, mlp_dim):
    ks = jax.random.split(key, 9)
    s = 0.02
    f = jnp.float32
    # Per-head weight layout (a reparametrisation of the fused PyTorch Linears):
    #   to_qkv  == concat_h(x @ wq[h]), ...   ;  to_out == sum_h(ctx_h @ wout[h]) + bout
    return {
        "wq":   (jax.random.normal(ks[0], (heads, dim, dim_head)) * s).astype(f),
        "wk":   (jax.random.normal(ks[1], (heads, dim, dim_head)) * s).astype(f),
        "wv":   (jax.random.normal(ks[2], (heads, dim, dim_head)) * s).astype(f),
        "wout": (jax.random.normal(ks[3], (heads, dim_head, dim)) * s).astype(f),
        "bout": (jax.random.normal(ks[4], (1, dim)) * s).astype(f),
        "w1":   (jax.random.normal(ks[5], (dim, mlp_dim)) * s).astype(f),
        "b1":   (jax.random.normal(ks[6], (1, mlp_dim)) * s).astype(f),
        "w2":   (jax.random.normal(ks[7], (mlp_dim, dim)) * s).astype(f),
        "b2":   jnp.zeros((1, dim), f),
    }


def transformer_block_ref(x, params, *, heads, dim_head):
    """Pure-JAX reference for verification."""
    scale = dim_head ** (-0.5)
    q = jnp.einsum("bnd,hde->bhne", x, params["wq"])
    k = jnp.einsum("bnd,hde->bhne", x, params["wk"])
    v = jnp.einsum("bnd,hde->bhne", x, params["wv"])
    dots = jnp.einsum("bhne,bhme->bhnm", q, k) * scale
    attn = jax.nn.softmax(dots, axis=-1)
    out = jnp.einsum("bhnm,bhme->bhne", attn, v)
    attn_out = jnp.einsum("bhne,hed->bnd", out, params["wout"]) + params["bout"][0]
    x1 = attn_out + x
    h1 = x1 @ params["w1"] + params["b1"][0]
    g = jax.nn.gelu(h1, approximate=False)
    y = g @ params["w2"] + params["b2"][0]
    return y + x1


if __name__ == "__main__":
    B, N, dim = 2, 8, 32
    heads, dim_head, mlp_dim = 4, 16, 64

    key = jax.random.PRNGKey(0)
    kx, kp = jax.random.split(key)
    x = jax.random.normal(kx, (B, N, dim), dtype=jnp.float32)
    params = init_params(kp, dim, heads, dim_head, mlp_dim)

    ref = transformer_block_ref(x, params, heads=heads, dim_head=dim_head)

    # f32 MXU operands (safe everywhere, incl. v5e).
    out = transformer_block(x, params, heads=heads, dim_head=dim_head)
    out = jax.block_until_ready(out)
    assert out.shape == (B, N, dim)
    err = jnp.max(jnp.abs(out - ref))
    assert jnp.allclose(out, ref, atol=2e-3, rtol=2e-3), f"f32 max err {err}"

    # bf16 MXU operands (v6e/v7x fast path); accumulation/elementwise stay f32.
    out_bf16 = transformer_block(x, params, heads=heads, dim_head=dim_head,
                                 mm_dtype=jnp.bfloat16)
    out_bf16 = jax.block_until_ready(out_bf16)
    err_bf16 = jnp.max(jnp.abs(out_bf16 - ref))
    assert jnp.allclose(out_bf16, ref, atol=5e-2, rtol=5e-2), f"bf16 max err {err_bf16}"

    print("KERNEL_OK")
</pallas_src>

<mosaic_0001>
module attributes {stable_mosaic.version = 11 : i64} {
  func.func @_transformer_block_kernel(%arg0: i32, %arg1: memref<16x32xf32, #tpu.memory_space<vmem>>, %arg2: memref<4x32x16xf32, #tpu.memory_space<vmem>>, %arg3: memref<4x32x16xf32, #tpu.memory_space<vmem>>, %arg4: memref<4x32x16xf32, #tpu.memory_space<vmem>>, %arg5: memref<4x16x32xf32, #tpu.memory_space<vmem>>, %arg6: memref<1x32xf32, #tpu.memory_space<vmem>>, %arg7: memref<32x64xf32, #tpu.memory_space<vmem>>, %arg8: memref<1x64xf32, #tpu.memory_space<vmem>>, %arg9: memref<64x32xf32, #tpu.memory_space<vmem>>, %arg10: memref<1x32xf32, #tpu.memory_space<vmem>>, %arg11: memref<16x32xf32, #tpu.memory_space<vmem>>) attributes {dimension_semantics = [#tpu.dimension_semantics<parallel>], iteration_bounds = array<i64: 1>, scalar_prefetch = 0 : i64, scratch_operands = 0 : i64, tpu.core_type = #tpu.core_type<tc>, window_params = [{transform_indices = @transform_0, window_bounds = array<i64: 16, 32>}, {pipeline_mode = #tpu.pipeline_mode<synchronous>, transform_indices = @transform_1, window_bounds = array<i64: 4, 32, 16>}, {pipeline_mode = #tpu.pipeline_mode<synchronous>, transform_indices = @transform_2, window_bounds = array<i64: 4, 32, 16>}, {pipeline_mode = #tpu.pipeline_mode<synchronous>, transform_indices = @transform_3, window_bounds = array<i64: 4, 32, 16>}, {pipeline_mode = #tpu.pipeline_mode<synchronous>, transform_indices = @transform_4, window_bounds = array<i64: 4, 16, 32>}, {pipeline_mode = #tpu.pipeline_mode<synchronous>, transform_indices = @transform_5, window_bounds = array<i64: 1, 32>}, {pipeline_mode = #tpu.pipeline_mode<synchronous>, transform_indices = @transform_6, window_bounds = array<i64: 32, 64>}, {pipeline_mode = #tpu.pipeline_mode<synchronous>, transform_indices = @transform_7, window_bounds = array<i64: 1, 64>}, {pipeline_mode = #tpu.pipeline_mode<synchronous>, transform_indices = @transform_8, window_bounds = array<i64: 64, 32>}, {pipeline_mode = #tpu.pipeline_mode<synchronous>, transform_indices = @transform_9, window_bounds = array<i64: 1, 32>}, {transform_indices = @transform_10, window_bounds = array<i64: 16, 32>}]} {
    %c0 = arith.constant 0 : index
    %c0_0 = arith.constant 0 : index
    %0 = vector.load %arg1[%c0, %c0_0] : memref<16x32xf32, #tpu.memory_space<vmem>>, vector<16x32xf32>
    %cst = arith.constant 0.000000e+00 : f32
    %1 = vector.broadcast %cst : f32 to vector<16x32xf32>
    %c0_1 = arith.constant 0 : index
    %c0_2 = arith.constant 0 : index
    %c0_3 = arith.constant 0 : index
    %2 = vector.load %arg2[%c0_1, %c0_2, %c0_3] : memref<4x32x16xf32, #tpu.memory_space<vmem>>, vector<1x32x16xf32>
    %3 = vector.shape_cast %2 : vector<1x32x16xf32> to vector<32x16xf32>
    %cst_4 = arith.constant dense<0.000000e+00> : vector<16x16xf32>
    %4 = tpu.matmul %0, %3, %cst_4 {dimension_numbers = #tpu.dot_dimension_numbers<[1], [0], [0], [1], [0, 0, 1, 1], [], []>} : vector<16x32xf32>, vector<32x16xf32>, vector<16x16xf32> -> vector<16x16xf32>
    %c0_5 = arith.constant 0 : index
    %c0_6 = arith.constant 0 : index
    %c0_7 = arith.constant 0 : index
    %5 = vector.load %arg3[%c0_5, %c0_6, %c0_7] : memref<4x32x16xf32, #tpu.memory_space<vmem>>, vector<1x32x16xf32>
    %6 = vector.shape_cast %5 : vector<1x32x16xf32> to vector<32x16xf32>
    %cst_8 = arith.constant dense<0.000000e+00> : vector<16x16xf32>
    %7 = tpu.matmul %0, %6, %cst_8 {dimension_numbers = #tpu.dot_dimension_numbers<[1], [0], [0], [1], [0, 0, 1, 1], [], []>} : vector<16x32xf32>, vector<32x16xf32>, vector<16x16xf32> -> vector<16x16xf32>
    %c0_9 = arith.constant 0 : index
    %c0_10 = arith.constant 0 : index
    %c0_11 = arith.constant 0 : index
    %8 = vector.load %arg4[%c0_9, %c0_10, %c0_11] : memref<4x32x16xf32, #tpu.memory_space<vmem>>, vector<1x32x16xf32>
    %9 = vector.shape_cast %8 : vector<1x32x16xf32> to vector<32x16xf32>
    %cst_12 = arith.constant dense<0.000000e+00> : vector<16x16xf32>
    %10 = tpu.matmul %0, %9, %cst_12 {dimension_numbers = #tpu.dot_dimension_numbers<[1], [0], [0], [1], [0, 0, 1, 1], [], []>} : vector<16x32xf32>, vector<32x16xf32>, vector<16x16xf32> -> vector<16x16xf32>
    %11 = vector.shape_cast %4 : vector<16x16xf32> to vector<2x8x16xf32>
    %12 = vector.shape_cast %7 : vector<16x16xf32> to vector<2x8x16xf32>
    %13 = vector.shape_cast %10 : vector<16x16xf32> to vector<2x8x16xf32>
    "tpu.trace_start"() <{level = 10 : i32, message = "bnd,bmd->bnm"}> : () -> ()
    %cst_13 = arith.constant dense<0.000000e+00> : vector<2x8x8xf32>
    %14 = tpu.matmul %11, %12, %cst_13 {dimension_numbers = #tpu.dot_dimension_numbers<[2], [2], [1], [1], [0, 0, 0, 1, 1, 1], [0], [0]>} : vector<2x8x16xf32>, vector<2x8x16xf32>, vector<2x8x8xf32> -> vector<2x8x8xf32>
    "tpu.trace_stop"() : () -> ()
    %cst_14 = arith.constant 2.500000e-01 : f32
    %15 = vector.broadcast %cst_14 : f32 to vector<2x8x8xf32>
    %16 = arith.mulf %14, %15 : vector<2x8x8xf32>
    %cst_15 = arith.constant dense<0xFF800000> : vector<2x8xf32>
    %17 = vector.multi_reduction <maximumf>, %16, %cst_15 [2] : vector<2x8x8xf32> to vector<2x8xf32>
    %18 = vector.shape_cast %17 : vector<2x8xf32> to vector<2x8x1xf32>
    %19 = vector.broadcast %18 : vector<2x8x1xf32> to vector<2x8x8xf32>
    %20 = arith.subf %16, %19 : vector<2x8x8xf32>
    %21 = math.exp %20 : vector<2x8x8xf32>
    %cst_16 = arith.constant dense<0.000000e+00> : vector<2x8xf32>
    %22 = vector.multi_reduction <add>, %21, %cst_16 [2] : vector<2x8x8xf32> to vector<2x8xf32>
    %23 = vector.shape_cast %22 : vector<2x8xf32> to vector<2x8x1xf32>
    %24 = tpu.reciprocal %23 {approx = true} : vector<2x8x1xf32> -> vector<2x8x1xf32>
    %25 = vector.broadcast %24 : vector<2x8x1xf32> to vector<2x8x8xf32>
    %26 = arith.mulf %21, %25 : vector<2x8x8xf32>
    "tpu.trace_start"() <{level = 10 : i32, message = "bnm,bmd->bnd"}> : () -> ()
    %cst_17 = arith.constant dense<0.000000e+00> : vector<2x8x16xf32>
    %27 = tpu.matmul %26, %13, %cst_17 {dimension_numbers = #tpu.dot_dimension_numbers<[2], [1], [1], [2], [0, 0, 0, 1, 1, 2], [0], [0]>} : vector<2x8x8xf32>, vector<2x8x16xf32>, vector<2x8x16xf32> -> vector<2x8x16xf32>
    "tpu.trace_stop"() : () -> ()
    %28 = vector.shape_cast %27 : vector<2x8x16xf32> to vector<16x16xf32>
    %c0_18 = arith.constant 0 : index
    %c0_19 = arith.constant 0 : index
    %c0_20 = arith.constant 0 : index
    %29 = vector.load %arg5[%c0_18, %c0_19, %c0_20] : memref<4x16x32xf32, #tpu.memory_space<vmem>>, vector<1x16x32xf32>
    %30 = vector.shape_cast %29 : vector<1x16x32xf32> to vector<16x32xf32>
    %cst_21 = arith.constant dense<0.000000e+00> : vector<16x32xf32>
    %31 = tpu.matmul %28, %30, %cst_21 {dimension_numbers = #tpu.dot_dimension_numbers<[1], [0], [0], [1], [0, 0, 1, 1], [], []>} : vector<16x16xf32>, vector<16x32xf32>, vector<16x32xf32> -> vector<16x32xf32>
    %32 = arith.addf %1, %31 : vector<16x32xf32>
    %c1 = arith.constant 1 : index
    %c0_22 = arith.constant 0 : index
    %c0_23 = arith.constant 0 : index
    %33 = vector.load %arg2[%c1, %c0_22, %c0_23] : memref<4x32x16xf32, #tpu.memory_space<vmem>>, vector<1x32x16xf32>
    %34 = vector.shape_cast %33 : vector<1x32x16xf32> to vector<32x16xf32>
    %cst_24 = arith.constant dense<0.000000e+00> : vector<16x16xf32>
    %35 = tpu.matmul %0, %34, %cst_24 {dimension_numbers = #tpu.dot_dimension_numbers<[1], [0], [0], [1], [0, 0, 1, 1], [], []>} : vector<16x32xf32>, vector<32x16xf32>, vector<16x16xf32> -> vector<16x16xf32>
    %c1_25 = arith.constant 1 : index
    %c0_26 = arith.constant 0 : index
    %c0_27 = arith.constant 0 : index
    %36 = vector.load %arg3[%c1_25, %c0_26, %c0_27] : memref<4x32x16xf32, #tpu.memory_space<vmem>>, vector<1x32x16xf32>
    %37 = vector.shape_cast %36 : vector<1x32x16xf32> to vector<32x16xf32>
    %cst_28 = arith.constant dense<0.000000e+00> : vector<16x16xf32>
    %38 = tpu.matmul %0, %37, %cst_28 {dimension_numbers = #tpu.dot_dimension_numbers<[1], [0], [0], [1], [0, 0, 1, 1], [], []>} : vector<16x32xf32>, vector<32x16xf32>, vector<16x16xf32> -> vector<16x16xf32>
    %c1_29 = arith.constant 1 : index
    %c0_30 = arith.constant 0 : index
    %c0_31 = arith.constant 0 : index
    %39 = vector.load %arg4[%c1_29, %c0_30, %c0_31] : memref<4x32x16xf32, #tpu.memory_space<vmem>>, vector<1x32x16xf32>
    %40 = vector.shape_cast %39 : vector<1x32x16xf32> to vector<32x16xf32>
    %cst_32 = arith.constant dense<0.000000e+00> : vector<16x16xf32>
    %41 = tpu.matmul %0, %40, %cst_32 {dimension_numbers = #tpu.dot_dimension_numbers<[1], [0], [0], [1], [0, 0, 1, 1], [], []>} : vector<16x32xf32>, vector<32x16xf32>, vector<16x16xf32> -> vector<16x16xf32>
    %42 = vector.shape_cast %35 : vector<16x16xf32> to vector<2x8x16xf32>
    %43 = vector.shape_cast %38 : vector<16x16xf32> to vector<2x8x16xf32>
    %44 = vector.shape_cast %41 : vector<16x16xf32> to vector<2x8x16xf32>
    "tpu.trace_start"() <{level = 10 : i32, message = "bnd,bmd->bnm"}> : () -> ()
    %cst_33 = arith.constant dense<0.000000e+00> : vector<2x8x8xf32>
    %45 = tpu.matmul %42, %43, %cst_33 {dimension_numbers = #tpu.dot_dimension_numbers<[2], [2], [1], [1], [0, 0, 0, 1, 1, 1], [0], [0]>} : vector<2x8x16xf32>, vector<2x8x16xf32>, vector<2x8x8xf32> -> vector<2x8x8xf32>
    "tpu.trace_stop"() : () -> ()
    %cst_34 = arith.constant 2.500000e-01 : f32
    %46 = vector.broadcast %cst_34 : f32 to vector<2x8x8xf32>
    %47 = arith.mulf %45, %46 : vector<2x8x8xf32>
    %cst_35 = arith.constant dense<0xFF800000> : vector<2x8xf32>
    %48 = vector.multi_reduction <maximumf>, %47, %cst_35 [2] : vector<2x8x8xf32> to vector<2x8xf32>
    %49 = vector.shape_cast %48 : vector<2x8xf32> to vector<2x8x1xf32>
    %50 = vector.broadcast %49 : vector<2x8x1xf32> to vector<2x8x8xf32>
    %51 = arith.subf %47, %50 : vector<2x8x8xf32>
    %52 = math.exp %51 : vector<2x8x8xf32>
    %cst_36 = arith.constant dense<0.000000e+00> : vector<2x8xf32>
    %53 = vector.multi_reduction <add>, %52, %cst_36 [2] : vector<2x8x8xf32> to vector<2x8xf32>
    %54 = vector.shape_cast %53 : vector<2x8xf32> to vector<2x8x1xf32>
    %55 = tpu.reciprocal %54 {approx = true} : vector<2x8x1xf32> -> vector<2x8x1xf32>
    %56 = vector.broadcast %55 : vector<2x8x1xf32> to vector<2x8x8xf32>
    %57 = arith.mulf %52, %56 : vector<2x8x8xf32>
    "tpu.trace_start"() <{level = 10 : i32, message = "bnm,bmd->bnd"}> : () -> ()
    %cst_37 = arith.constant dense<0.000000e+00> : vector<2x8x16xf32>
    %58 = tpu.matmul %57, %44, %cst_37 {dimension_numbers = #tpu.dot_dimension_numbers<[2], [1], [1], [2], [0, 0, 0, 1, 1, 2], [0], [0]>} : vector<2x8x8xf32>, vector<2x8x16xf32>, vector<2x8x16xf32> -> vector<2x8x16xf32>
    "tpu.trace_stop"() : () -> ()
    %59 = vector.shape_cast %58 : vector<2x8x16xf32> to vector<16x16xf32>
    %c1_38 = arith.constant 1 : index
    %c0_39 = arith.constant 0 : index
    %c0_40 = arith.constant 0 : index
    %60 = vector.load %arg5[%c1_38, %c0_39, %c0_40] : memref<4x16x32xf32, #tpu.memory_space<vmem>>, vector<1x16x32xf32>
    %61 = vector.shape_cast %60 : vector<1x16x32xf32> to vector<16x32xf32>
    %cst_41 = arith.constant dense<0.000000e+00> : vector<16x32xf32>
    %62 = tpu.matmul %59, %61, %cst_41 {dimension_numbers = #tpu.dot_dimension_numbers<[1], [0], [0], [1], [0, 0, 1, 1], [], []>} : vector<16x16xf32>, vector<16x32xf32>, vector<16x32xf32> -> vector<16x32xf32>
    %63 = arith.addf %32, %62 : vector<16x32xf32>
    %c2 = arith.constant 2 : index
    %c0_42 = arith.constant 0 : index
    %c0_43 = arith.constant 0 : index
    %64 = vector.load %arg2[%c2, %c0_42, %c0_43] : memref<4x32x16xf32, #tpu.memory_space<vmem>>, vector<1x32x16xf32>
    %65 = vector.shape_cast %64 : vector<1x32x16xf32> to vector<32x16xf32>
    %cst_44 = arith.constant dense<0.000000e+00> : vector<16x16xf32>
    %66 = tpu.matmul %0, %65, %cst_44 {dimension_numbers = #tpu.dot_dimension_numbers<[1], [0], [0], [1], [0, 0, 1, 1], [], []>} : vector<16x32xf32>, vector<32x16xf32>, vector<16x16xf32> -> vector<16x16xf32>
    %c2_45 = arith.constant 2 : index
    %c0_46 = arith.constant 0 : index
    %c0_47 = arith.constant 0 : index
    %67 = vector.load %arg3[%c2_45, %c0_46, %c0_47] : memref<4x32x16xf32, #tpu.memory_space<vmem>>, vector<1x32x16xf32>
    %68 = vector.shape_cast %67 : vector<1x32x16xf32> to vector<32x16xf32>
    %cst_48 = arith.constant dense<0.000000e+00> : vector<16x16xf32>
    %69 = tpu.matmul %0, %68, %cst_48 {dimension_numbers = #tpu.dot_dimension_numbers<[1], [0], [0], [1], [0, 0, 1, 1], [], []>} : vector<16x32xf32>, vector<32x16xf32>, vector<16x16xf32> -> vector<16x16xf32>
    %c2_49 = arith.constant 2 : index
    %c0_50 = arith.constant 0 : index
    %c0_51 = arith.constant 0 : index
    %70 = vector.load %arg4[%c2_49, %c0_50, %c0_51] : memref<4x32x16xf32, #tpu.memory_space<vmem>>, vector<1x32x16xf32>
    %71 = vector.shape_cast %70 : vector<1x32x16xf32> to vector<32x16xf32>
    %cst_52 = arith.constant dense<0.000000e+00> : vector<16x16xf32>
    %72 = tpu.matmul %0, %71, %cst_52 {dimension_numbers = #tpu.dot_dimension_numbers<[1], [0], [0], [1], [0, 0, 1, 1], [], []>} : vector<16x32xf32>, vector<32x16xf32>, vector<16x16xf32> -> vector<16x16xf32>
    %73 = vector.shape_cast %66 : vector<16x16xf32> to vector<2x8x16xf32>
    %74 = vector.shape_cast %69 : vector<16x16xf32> to vector<2x8x16xf32>
    %75 = vector.shape_cast %72 : vector<16x16xf32> to vector<2x8x16xf32>
    "tpu.trace_start"() <{level = 10 : i32, message = "bnd,bmd->bnm"}> : () -> ()
    %cst_53 = arith.constant dense<0.000000e+00> : vector<2x8x8xf32>
    %76 = tpu.matmul %73, %74, %cst_53 {dimension_numbers = #tpu.dot_dimension_numbers<[2], [2], [1], [1], [0, 0, 0, 1, 1, 1], [0], [0]>} : vector<2x8x16xf32>, vector<2x8x16xf32>, vector<2x8x8xf32> -> vector<2x8x8xf32>
    "tpu.trace_stop"() : () -> ()
    %cst_54 = arith.constant 2.500000e-01 : f32
    %77 = vector.broadcast %cst_54 : f32 to vector<2x8x8xf32>
    %78 = arith.mulf %76, %77 : vector<2x8x8xf32>
    %cst_55 = arith.constant dense<0xFF800000> : vector<2x8xf32>
    %79 = vector.multi_reduction <maximumf>, %78, %cst_55 [2] : vector<2x8x8xf32> to vector<2x8xf32>
    %80 = vector.shape_cast %79 : vector<2x8xf32> to vector<2x8x1xf32>
    %81 = vector.broadcast %80 : vector<2x8x1xf32> to vector<2x8x8xf32>
    %82 = arith.subf %78, %81 : vector<2x8x8xf32>
    %83 = math.exp %82 : vector<2x8x8xf32>
    %cst_56 = arith.constant dense<0.000000e+00> : vector<2x8xf32>
    %84 = vector.multi_reduction <add>, %83, %cst_56 [2] : vector<2x8x8xf32> to vector<2x8xf32>
    %85 = vector.shape_cast %84 : vector<2x8xf32> to vector<2x8x1xf32>
    %86 = tpu.reciprocal %85 {approx = true} : vector<2x8x1xf32> -> vector<2x8x1xf32>
    %87 = vector.broadcast %86 : vector<2x8x1xf32> to vector<2x8x8xf32>
    %88 = arith.mulf %83, %87 : vector<2x8x8xf32>
    "tpu.trace_start"() <{level = 10 : i32, message = "bnm,bmd->bnd"}> : () -> ()
    %cst_57 = arith.constant dense<0.000000e+00> : vector<2x8x16xf32>
    %89 = tpu.matmul %88, %75, %cst_57 {dimension_numbers = #tpu.dot_dimension_numbers<[2], [1], [1], [2], [0, 0, 0, 1, 1, 2], [0], [0]>} : vector<2x8x8xf32>, vector<2x8x16xf32>, vector<2x8x16xf32> -> vector<2x8x16xf32>
    "tpu.trace_stop"() : () -> ()
    %90 = vector.shape_cast %89 : vector<2x8x16xf32> to vector<16x16xf32>
    %c2_58 = arith.constant 2 : index
    %c0_59 = arith.constant 0 : index
    %c0_60 = arith.constant 0 : index
    %91 = vector.load %arg5[%c2_58, %c0_59, %c0_60] : memref<4x16x32xf32, #tpu.memory_space<vmem>>, vector<1x16x32xf32>
    %92 = vector.shape_cast %91 : vector<1x16x32xf32> to vector<16x32xf32>
    %cst_61 = arith.constant dense<0.000000e+00> : vector<16x32xf32>
    %93 = tpu.matmul %90, %92, %cst_61 {dimension_numbers = #tpu.dot_dimension_numbers<[1], [0], [0], [1], [0, 0, 1, 1], [], []>} : vector<16x16xf32>, vector<16x32xf32>, vector<16x32xf32> -> vector<16x32xf32>
    %94 = arith.addf %63, %93 : vector<16x32xf32>
    %c3 = arith.constant 3 : index
    %c0_62 = arith.constant 0 : index
    %c0_63 = arith.constant 0 : index
    %95 = vector.load %arg2[%c3, %c0_62, %c0_63] : memref<4x32x16xf32, #tpu.memory_space<vmem>>, vector<1x32x16xf32>
    %96 = vector.shape_cast %95 : vector<1x32x16xf32> to vector<32x16xf32>
    %cst_64 = arith.constant dense<0.000000e+00> : vector<16x16xf32>
    %97 = tpu.matmul %0, %96, %cst_64 {dimension_numbers = #tpu.dot_dimension_numbers<[1], [0], [0], [1], [0, 0, 1, 1], [], []>} : vector<16x32xf32>, vector<32x16xf32>, vector<16x16xf32> -> vector<16x16xf32>
    %c3_65 = arith.constant 3 : index
    %c0_66 = arith.constant 0 : index
    %c0_67 = arith.constant 0 : index
    %98 = vector.load %arg3[%c3_65, %c0_66, %c0_67] : memref<4x32x16xf32, #tpu.memory_space<vmem>>, vector<1x32x16xf32>
    %99 = vector.shape_cast %98 : vector<1x32x16xf32> to vector<32x16xf32>
    %cst_68 = arith.constant dense<0.000000e+00> : vector<16x16xf32>
    %100 = tpu.matmul %0, %99, %cst_68 {dimension_numbers = #tpu.dot_dimension_numbers<[1], [0], [0], [1], [0, 0, 1, 1], [], []>} : vector<16x32xf32>, vector<32x16xf32>, vector<16x16xf32> -> vector<16x16xf32>
    %c3_69 = arith.constant 3 : index
    %c0_70 = arith.constant 0 : index
    %c0_71 = arith.constant 0 : index
    %101 = vector.load %arg4[%c3_69, %c0_70, %c0_71] : memref<4x32x16xf32, #tpu.memory_space<vmem>>, vector<1x32x16xf32>
    %102 = vector.shape_cast %101 : vector<1x32x16xf32> to vector<32x16xf32>
    %cst_72 = arith.constant dense<0.000000e+00> : vector<16x16xf32>
    %103 = tpu.matmul %0, %102, %cst_72 {dimension_numbers = #tpu.dot_dimension_numbers<[1], [0], [0], [1], [0, 0, 1, 1], [], []>} : vector<16x32xf32>, vector<32x16xf32>, vector<16x16xf32> -> vector<16x16xf32>
    %104 = vector.shape_cast %97 : vector<16x16xf32> to vector<2x8x16xf32>
    %105 = vector.shape_cast %100 : vector<16x16xf32> to vector<2x8x16xf32>
    %106 = vector.shape_cast %103 : vector<16x16xf32> to vector<2x8x16xf32>
    "tpu.trace_start"() <{level = 10 : i32, message = "bnd,bmd->bnm"}> : () -> ()
    %cst_73 = arith.constant dense<0.000000e+00> : vector<2x8x8xf32>
    %107 = tpu.matmul %104, %105, %cst_73 {dimension_numbers = #tpu.dot_dimension_numbers<[2], [2], [1], [1], [0, 0, 0, 1, 1, 1], [0], [0]>} : vector<2x8x16xf32>, vector<2x8x16xf32>, vector<2x8x8xf32> -> vector<2x8x8xf32>
    "tpu.trace_stop"() : () -> ()
    %cst_74 = arith.constant 2.500000e-01 : f32
    %108 = vector.broadcast %cst_74 : f32 to vector<2x8x8xf32>
    %109 = arith.mulf %107, %108 : vector<2x8x8xf32>
    %cst_75 = arith.constant dense<0xFF800000> : vector<2x8xf32>
    %110 = vector.multi_reduction <maximumf>, %109, %cst_75 [2] : vector<2x8x8xf32> to vector<2x8xf32>
    %111 = vector.shape_cast %110 : vector<2x8xf32> to vector<2x8x1xf32>
    %112 = vector.broadcast %111 : vector<2x8x1xf32> to vector<2x8x8xf32>
    %113 = arith.subf %109, %112 : vector<2x8x8xf32>
    %114 = math.exp %113 : vector<2x8x8xf32>
    %cst_76 = arith.constant dense<0.000000e+00> : vector<2x8xf32>
    %115 = vector.multi_reduction <add>, %114, %cst_76 [2] : vector<2x8x8xf32> to vector<2x8xf32>
    %116 = vector.shape_cast %115 : vector<2x8xf32> to vector<2x8x1xf32>
    %117 = tpu.reciprocal %116 {approx = true} : vector<2x8x1xf32> -> vector<2x8x1xf32>
    %118 = vector.broadcast %117 : vector<2x8x1xf32> to vector<2x8x8xf32>
    %119 = arith.mulf %114, %118 : vector<2x8x8xf32>
    "tpu.trace_start"() <{level = 10 : i32, message = "bnm,bmd->bnd"}> : () -> ()
    %cst_77 = arith.constant dense<0.000000e+00> : vector<2x8x16xf32>
    %120 = tpu.matmul %119, %106, %cst_77 {dimension_numbers = #tpu.dot_dimension_numbers<[2], [1], [1], [2], [0, 0, 0, 1, 1, 2], [0], [0]>} : vector<2x8x8xf32>, vector<2x8x16xf32>, vector<2x8x16xf32> -> vector<2x8x16xf32>
    "tpu.trace_stop"() : () -> ()
    %121 = vector.shape_cast %120 : vector<2x8x16xf32> to vector<16x16xf32>
    %c3_78 = arith.constant 3 : index
    %c0_79 = arith.constant 0 : index
    %c0_80 = arith.constant 0 : index
    %122 = vector.load %arg5[%c3_78, %c0_79, %c0_80] : memref<4x16x32xf32, #tpu.memory_space<vmem>>, vector<1x16x32xf32>
    %123 = vector.shape_cast %122 : vector<1x16x32xf32> to vector<16x32xf32>
    %cst_81 = arith.constant dense<0.000000e+00> : vector<16x32xf32>
    %124 = tpu.matmul %121, %123, %cst_81 {dimension_numbers = #tpu.dot_dimension_numbers<[1], [0], [0], [1], [0, 0, 1, 1], [], []>} : vector<16x16xf32>, vector<16x32xf32>, vector<16x32xf32> -> vector<16x32xf32>
    %125 = arith.addf %94, %124 : vector<16x32xf32>
    %c0_82 = arith.constant 0 : index
    %c0_83 = arith.constant 0 : index
    %126 = vector.load %arg6[%c0_82, %c0_83] : memref<1x32xf32, #tpu.memory_space<vmem>>, vector<1x32xf32>
    %127 = vector.broadcast %126 : vector<1x32xf32> to vector<16x32xf32>
    %128 = arith.addf %125, %127 : vector<16x32xf32>
    %129 = arith.addf %128, %0 : vector<16x32xf32>
    %c0_84 = arith.constant 0 : index
    %c0_85 = arith.constant 0 : index
    %130 = vector.load %arg7[%c0_84, %c0_85] : memref<32x64xf32, #tpu.memory_space<vmem>>, vector<32x64xf32>
    %cst_86 = arith.constant dense<0.000000e+00> : vector<16x64xf32>
    %131 = tpu.matmul %129, %130, %cst_86 {dimension_numbers = #tpu.dot_dimension_numbers<[1], [0], [0], [1], [0, 0, 1, 1], [], []>} : vector<16x32xf32>, vector<32x64xf32>, vector<16x64xf32> -> vector<16x64xf32>
    %c0_87 = arith.constant 0 : index
    %c0_88 = arith.constant 0 : index
    %132 = vector.load %arg8[%c0_87, %c0_88] : memref<1x64xf32, #tpu.memory_space<vmem>>, vector<1x64xf32>
    %133 = vector.broadcast %132 : vector<1x64xf32> to vector<16x64xf32>
    %134 = arith.addf %131, %133 : vector<16x64xf32>
    %cst_89 = arith.constant 5.000000e-01 : f32
    %135 = vector.broadcast %cst_89 : f32 to vector<16x64xf32>
    %136 = arith.mulf %135, %134 : vector<16x64xf32>
    %cst_90 = arith.constant 0.707106769 : f32
    %137 = vector.broadcast %cst_90 : f32 to vector<16x64xf32>
    %138 = arith.mulf %134, %137 : vector<16x64xf32>
    %139 = math.erf %138 : vector<16x64xf32>
    %cst_91 = arith.constant 1.000000e+00 : f32
    %140 = vector.broadcast %cst_91 : f32 to vector<16x64xf32>
    %141 = arith.addf %140, %139 : vector<16x64xf32>
    %142 = arith.mulf %136, %141 : vector<16x64xf32>
    %c0_92 = arith.constant 0 : index
    %c0_93 = arith.constant 0 : index
    %143 = vector.load %arg9[%c0_92, %c0_93] : memref<64x32xf32, #tpu.memory_space<vmem>>, vector<64x32xf32>
    %cst_94 = arith.constant dense<0.000000e+00> : vector<16x32xf32>
    %144 = tpu.matmul %142, %143, %cst_94 {dimension_numbers = #tpu.dot_dimension_numbers<[1], [0], [0], [1], [0, 0, 1, 1], [], []>} : vector<16x64xf32>, vector<64x32xf32>, vector<16x32xf32> -> vector<16x32xf32>
    %c0_95 = arith.constant 0 : index
    %c0_96 = arith.constant 0 : index
    %145 = vector.load %arg10[%c0_95, %c0_96] : memref<1x32xf32, #tpu.memory_space<vmem>>, vector<1x32xf32>
    %146 = vector.broadcast %145 : vector<1x32xf32> to vector<16x32xf32>
    %147 = arith.addf %144, %146 : vector<16x32xf32>
    %148 = arith.addf %147, %129 : vector<16x32xf32>
    %c0_97 = arith.constant 0 : index
    %c0_98 = arith.constant 0 : index
    %149 = vector.load %arg11[%c0_97, %c0_98] : memref<16x32xf32, #tpu.memory_space<vmem>>, vector<16x32xf32>
    tpu.vector_store %arg11[%c0_97, %c0_98], %148 {strides = array<i32>} : memref<16x32xf32, #tpu.memory_space<vmem>>, vector<16x32xf32>,
    return
  }
  func.func @transform_0(%arg0: i32) -> (i32, i32) {
    %c0_i32 = arith.constant 0 : i32
    %c0_i32_0 = arith.constant 0 : i32
    return %arg0, %c0_i32 : i32, i32
  }
  func.func @transform_1(%arg0: i32) -> (i32, i32, i32) {
    %c0_i32 = arith.constant 0 : i32
    %c0_i32_0 = arith.constant 0 : i32
    %c0_i32_1 = arith.constant 0 : i32
    %c0_i32_2 = arith.constant 0 : i32
    return %c0_i32, %c0_i32_0, %c0_i32_1 : i32, i32, i32
  }
  func.func @transform_2(%arg0: i32) -> (i32, i32, i32) {
    %c0_i32 = arith.constant 0 : i32
    %c0_i32_0 = arith.constant 0 : i32
    %c0_i32_1 = arith.constant 0 : i32
    %c0_i32_2 = arith.constant 0 : i32
    return %c0_i32, %c0_i32_0, %c0_i32_1 : i32, i32, i32
  }
  func.func @transform_3(%arg0: i32) -> (i32, i32, i32) {
    %c0_i32 = arith.constant 0 : i32
    %c0_i32_0 = arith.constant 0 : i32
    %c0_i32_1 = arith.constant 0 : i32
    %c0_i32_2 = arith.constant 0 : i32
    return %c0_i32, %c0_i32_0, %c0_i32_1 : i32, i32, i32
  }
  func.func @transform_4(%arg0: i32) -> (i32, i32, i32) {
    %c0_i32 = arith.constant 0 : i32
    %c0_i32_0 = arith.constant 0 : i32
    %c0_i32_1 = arith.constant 0 : i32
    %c0_i32_2 = arith.constant 0 : i32
    return %c0_i32, %c0_i32_0, %c0_i32_1 : i32, i32, i32
  }
  func.func @transform_5(%arg0: i32) -> (i32, i32) {
    %c0_i32 = arith.constant 0 : i32
    %c0_i32_0 = arith.constant 0 : i32
    %c0_i32_1 = arith.constant 0 : i32
    return %c0_i32, %c0_i32_0 : i32, i32
  }
  func.func @transform_6(%arg0: i32) -> (i32, i32) {
    %c0_i32 = arith.constant 0 : i32
    %c0_i32_0 = arith.constant 0 : i32
    %c0_i32_1 = arith.constant 0 : i32
    return %c0_i32, %c0_i32_0 : i32, i32
  }
  func.func @transform_7(%arg0: i32) -> (i32, i32) {
    %c0_i32 = arith.constant 0 : i32
    %c0_i32_0 = arith.constant 0 : i32
    %c0_i32_1 = arith.constant 0 : i32
    return %c0_i32, %c0_i32_0 : i32, i32
  }
  func.func @transform_8(%arg0: i32) -> (i32, i32) {
    %c0_i32 = arith.constant 0 : i32
    %c0_i32_0 = arith.constant 0 : i32
    %c0_i32_1 = arith.constant 0 : i32
    return %c0_i32, %c0_i32_0 : i32, i32
  }
  func.func @transform_9(%arg0: i32) -> (i32, i32) {
    %c0_i32 = arith.constant 0 : i32
    %c0_i32_0 = arith.constant 0 : i32
    %c0_i32_1 = arith.constant 0 : i32
    return %c0_i32, %c0_i32_0 : i32, i32
  }
  func.func @transform_10(%arg0: i32) -> (i32, i32) {
    %c0_i32 = arith.constant 0 : i32
    %c0_i32_0 = arith.constant 0 : i32
    return %arg0, %c0_i32 : i32, i32
  }
}

</mosaic_0001>

<bundles_post_ra>
// kernel: tpu_custom_call.1
= control target key start
LH: loop header
LB: loop body
LE: loop exit
PB: predicated region body
PF: predicated region fallthrough
CT: control target
= control target key end

     0   :  { %s1792_s0 = inlined_call_operand.vmem [shape: f32[16,32], index: 0, kind: input, shape index: {}]   ;;  %s1793_s1 = inlined_call_operand.vmem [shape: f32[4,32,16], index: 1, kind: input, shape index: {}]   ;;  %s1794_s2 = inlined_call_operand.vmem [shape: f32[4,32,16], index: 2, kind: input, shape index: {}]   ;;  %s1795_s3 = inlined_call_operand.vmem [shape: f32[4,32,16], index: 3, kind: input, shape index: {}]   ;;  %s1796_s4 = inlined_call_operand.vmem [shape: f32[4,16,32], index: 4, kind: input, shape index: {}]   ;;  %s1797_s5 = inlined_call_operand.vmem [shape: f32[1,32], index: 5, kind: input, shape index: {}]   ;;  %s1798_s6 = inlined_call_operand.vmem [shape: f32[32,64], index: 6, kind: input, shape index: {}]   ;;  %s1799_s7 = inlined_call_operand.vmem [shape: f32[1,64], index: 7, kind: input, shape index: {}]   ;;  %s1800_s8 = inlined_call_operand.vmem [shape: f32[64,32], index: 8, kind: input, shape index: {}]   ;;  %s1801_s9 = inlined_call_operand.vmem [shape: f32[1,32], index: 9, kind: input, shape index: {}]   ;;  %s1802_s10 = inlined_call_operand.hbm [shape: f32[16,32], index: 10, kind: output, shape index: {}]  }
   0x1   :  { %v75_v0 = vld [vmem:[%s1794_s2 + $0x18] sm:$0xff]  ;;  %v74_v1 = vld [vmem:[%s1794_s2 + $0x10] sm:$0xff]  ;;  %v73_v4 = vld [vmem:[%s1794_s2 + $0x8] sm:$0xff] }
   0x2   :  { %v41_v2 = vld [vmem:[%s1793_s1 + $0x18] sm:$0xff]  ;;  %88 = vmatpush.msra.mxu1 %v75_v0  ;;  %v40_v3 = vld [vmem:[%s1793_s1 + $0x10] sm:$0xff]  ;;  %v39_v5 = vld [vmem:[%s1793_s1 + $0x8] sm:$0xff] }
   0x3   :  { %61 = vmatpush.msra.mxu0 %v41_v2  ;;  %v72_v6 = vld [vmem:[%s1794_s2] sm:$0xff] }
   0x4   :  { %89 = vmatpush.msra.mxu1 %v74_v1  ;;  %v38_v7 = vld [vmem:[%s1793_s1] sm:$0xff] }
   0x5   :  { %62 = vmatpush.msra.mxu0 %v40_v3 }
   0x6   :  { %15 = vsyncpa [#allocation3], 0  ;;  %90 = vmatpush.msra.mxu1 %v73_v4  ;;  %v1453_v8 = vld [vmem:[%s1792_s0] sm:$0xff]  ;;  %vm42_vm0 = vcmask 261120   ;;  %v1462_v9 = vld [vmem:[%s1792_s0 + $0x8] sm:$0xff]  ;;  %vm126_vm1 = vcmask 130048  }
   0x7   :  { %63 = vmatpush.msra.mxu0 %v39_v5  ;;  %v102_v14 = vld [vmem:[%s1795_s3 + $0x18] sm:$0xff]  ;;  %v101_v15 = vld [vmem:[%s1795_s3 + $0x10] sm:$0xff]  ;;  %v100_v16 = vld [vmem:[%s1795_s3 + $0x8] sm:$0xff]  ;;  %vm181_vm2 = vcmask 64512   ;;  %vm1144_vm9 = vcmask 523264   ;;  %s1368_s22 = smov [#allocation2]  }
   0x8   :  { %91 = vmatpush.msra.mxu1 %v72_v6  ;;  %115 = vmatpush.msra.mxu2 %v102_v14  ;;  %v99_v23 = vld [vmem:[%s1795_s3] sm:$0xff]  ;;  %v1217_v24 = vld [vmem:[%s1794_s2 + $0x38] sm:$0xff]  ;;  %v1216_v25 = vld [vmem:[%s1794_s2 + $0x30] sm:$0xff]  ;;  %s1182_s23 = sshll.u32 %s1368_s22, 4  ;;  %s1184_s26 = sshll.u32 %s1802_s10, 4  ;;  %s1183_s23 = int_to_ptr.vmem [resolvable:$true] %s1182_s23  ;;  %s1185_s26 = int_to_ptr.hbm [resolvable:$true] %s1184_s26 }
   0x9   :  { %64 = vmatpush.msra.mxu0 %v38_v7  ;;  %1198 = vmatmul.msk.f32.vlgmr.msra.gmra.mxu1 %vm42_vm0, %v1453_v8  ;;  %v1215_v26 = vld [vmem:[%s1794_s2 + $0x28] sm:$0xff]  ;;  %v1211_v27 = vld [vmem:[%s1793_s1 + $0x38] sm:$0xff]  ;;  %v1214_v28 = vld [vmem:[%s1794_s2 + $0x20] sm:$0xff] }
   0xa   :  { %1196 = vmatmul.msk.f32.vlgmr.msra.gmra.mxu0 %vm42_vm0, %v1453_v8  ;;  %116 = vmatpush.msra.mxu2 %v101_v15  ;;  %v1210_v29 = vld [vmem:[%s1793_s1 + $0x30] sm:$0xff]  ;;  %v1209_v30 = vld [vmem:[%s1793_s1 + $0x28] sm:$0xff]  ;;  %v1208_v31 = vld [vmem:[%s1793_s1 + $0x20] sm:$0xff] }
   0xb   :  { %269 = vmatpush.msrb.mxu1 %v1211_v27  ;;  %v251_v53 = vld [vmem:[%s1796_s4 + $0x8] sm:$0xff]  ;;  %v250_v55 = vld [vmem:[%s1796_s4] sm:$0xff]  ;;  %v1223_v56 = vld [vmem:[%s1795_s3 + $0x38] sm:$0xff] }
   0xc   :  { %117 = vmatpush.msra.mxu2 %v100_v16  ;;  %v1222_v1 = vld [vmem:[%s1795_s3 + $0x30] sm:$0xff]  ;;  %v1221_v2 = vld [vmem:[%s1795_s3 + $0x28] sm:$0xff]  ;;  %v1220_v3 = vld [vmem:[%s1795_s3 + $0x20] sm:$0xff] }
   0xd   :  { %270 = vmatpush.msrb.mxu1 %v1210_v29 }
   0xe   :  { %118 = vmatpush.msra.mxu2 %v99_v23  ;;  %v1240_v23 = vld [vmem:[%s1793_s1 + $0x50] sm:$0xff] }
   0xf   :  { %1200 = vmatmul.msk.f32.vlgmr.msra.gmra.mxu2 %vm42_vm0, %v1453_v8  ;;  %271 = vmatpush.msrb.mxu1 %v1209_v30 }
  0x10   :  { %297 = vmatpush.msrb.mxu2 %v1217_v24  ;;  %v1239_v24 = vld [vmem:[%s1793_s1 + $0x48] sm:$0xff] }
  0x11   :  { %1199 = vmatmul.msk.f32.gmra.mxu1 %vm42_vm0, %v1462_v9 }
  0x12   :  { %1197 = vmatmul.msk.f32.gmra.mxu0 %vm42_vm0, %v1462_v9  ;;  %298 = vmatpush.msrb.mxu2 %v1216_v25  ;;  %v1238_v25 = vld [vmem:[%s1793_s1 + $0x40] sm:$0xff] }
  0x13   :  { %272 = vmatpush.msrb.mxu1 %v1208_v31 }
  0x14   :  { %299 = vmatpush.msrb.mxu2 %v1215_v26 }
  0x16   :  { %300 = vmatpush.msrb.mxu2 %v1214_v28 }
  0x17   :  { %1201 = vmatmul.msk.f32.gmra.mxu2 %vm42_vm0, %v1462_v9 }
  0x19   :  { %1212 = vmatmul.msk.f32.vlgmr.msrb.gmra.mxu1 %vm42_vm0, %v1453_v8 }
  0x1f   :  { %1218 = vmatmul.msk.f32.vlgmr.msrb.gmra.mxu2 %vm42_vm0, %v1453_v8 }
  0x21   :  { %1213 = vmatmul.msk.f32.gmra.mxu1 %vm42_vm0, %v1462_v9 }
  0x27   :  { %1219 = vmatmul.msk.f32.gmra.mxu2 %vm42_vm0, %v1462_v9 }
  0x86   :  { %v93_v10 = vpop.f32.mrf.mxu1 }
  0x87   :  { %v66_v11 = vpop.f32.mrf.mxu0  ;;  %1202 = vmatpush.xpose.msk.msra.mxu3 %vm126_vm1, %v93_v10 }
  0x8a   :  { %1203 = vmatmul.msk.f32.vlgmr.msra.gmra.mxu3 %vm126_vm1, %v66_v11 }
  0x8e   :  { %v96_v12 = vpop.f32.mrf.mxu1 }
  0x8f   :  { %1204 = vmatpush.xpose.msk.msrb.mxu3 %vm126_vm1, %v96_v12  ;;  %v69_v13 = vpop.f32.mrf.mxu0 }
  0x92   :  { %1205 = vmatmul.msk.f32.vlgmr.msrb.gmra.mxu3 %vm126_vm1, %v69_v13  ;;  %v120_v42 = vpop.f32.mrf.mxu2 }
  0x93   :  { %222 = vmatpush.msra.mxu3 %v120_v42 }
  0x95   :  { %325 = vmatpush.msrb.mxu3 %v1223_v56 }
  0x96   :  { %v274_v52 = vpop.f32.mrf.mxu1 }
  0x97   :  { %326 = vmatpush.msrb.mxu3 %v1222_v1 }
  0x99   :  { %327 = vmatpush.msrb.mxu3 %v1221_v2  ;;  %v1274_v2 = vld [vmem:[%s1794_s2 + $0x70] sm:$0xff] }
  0x9a   :  { %v123_v43 = vpop.f32.mrf.mxu2 }
  0x9b   :  { %245 = vmatpush.msrb.mxu0 %v123_v43  ;;  %328 = vmatpush.msrb.mxu3 %v1220_v3  ;;  %v1251_v43 = vld [vmem:[%s1795_s3 + $0x48] sm:$0xff]  ;;  %v1269_v3 = vld [vmem:[%s1793_s1 + $0x78] sm:$0xff] }
  0x9e   :  { %v277_v54 = vpop.f32.mrf.mxu1 }
  0xa2   :  { %v302_v44 = vpop.f32.mrf.mxu2 }
  0xa3   :  { %1226 = vmatpush.xpose.msk.msra.mxu0 %vm126_vm1, %v302_v44 }
  0xaa   :  { %v305_v51 = vpop.f32.mrf.mxu2 }
 0x10d   :  { %v150_v17 = vpop.f32.mrf.mxu3 }
 0x10e   :  { %v179_v18 = vmul.f32 0.25, %v150_v17 }
 0x110   :  { %v182_v19 = vsel %vm181_vm2, %v179_v18, -inf }
 0x111   :  { %183 = vmax.xlane.f32.xlu1 %v182_v19  ;;  %v1246_v19 = vld [vmem:[%s1794_s2 + $0x50] sm:$0xff] }
 0x115   :  { %v176_v20 = vpop.f32.mrf.mxu3 }
 0x116   :  { %v180_v21 = vmul.f32 0.25, %v176_v20  ;;  %v1245_v20 = vld [vmem:[%s1794_s2 + $0x48] sm:$0xff] }
 0x118   :  { %v185_v22 = vsel %vm181_vm2, %v180_v21, -inf }
 0x119   :  { %186 = vmax.xlane.f32.xlu0 %v185_v22  ;;  %v1241_v22 = vld [vmem:[%s1793_s1 + $0x58] sm:$0xff] }
 0x184   :  { %v184_v32 = vpop.xlane.xlu1 %183 }
 0x185   :  { %v188_v33 = vsub.f32 %v179_v18, %v184_v32  ;;  %v1247_v18 = vld [vmem:[%s1794_s2 + $0x58] sm:$0xff] }
 0x186   :  { %v1233_v32 = vld [vmem:[%s1796_s4 + $0x18] sm:$0xff] }
 0x187   :  { %v190_v34 = vmul.f32 1.442695, %v188_v33  ;;  %v1232_v33 = vld [vmem:[%s1796_s4 + $0x10] sm:$0xff] }
 0x189   :  { %1306 = vpow2.f32 %v190_v34 }
 0x18c   :  { %v187_v35 = vpop.xlane.xlu0 %186 }
 0x18d   :  { %v189_v36 = vsub.f32 %v180_v21, %v187_v35  ;;  %v1244_v21 = vld [vmem:[%s1794_s2 + $0x40] sm:$0xff] }
 0x18f   :  { %v1307_v37 = vpop.eup %1306  ;;  %v192_v38 = vmul.f32 1.442695, %v189_v36 }
 0x190   :  { %v194_v39 = vsel %vm181_vm2, %v1307_v37, 0.0 }
 0x191   :  { %1308 = vpow2.f32 %v192_v38  ;;  %195 = vadd.xlane.f32.xlu1 %v194_v39 }
 0x197   :  { %v1309_v40 = vpop.eup %1308 }
 0x198   :  { %v197_v41 = vsel %vm181_vm2, %v1309_v40, 0.0 }
 0x199   :  { %198 = vadd.xlane.f32.xlu0 %v197_v41  ;;  %v1252_v41 = vld [vmem:[%s1795_s3 + $0x50] sm:$0xff] }
 0x204   :  { %v196_v45 = vpop.xlane.xlu1 %195 }
 0x205   :  { %1310 = vrcp.f32 %v196_v45 }
 0x20b   :  { %v1311_v46 = vpop.eup %1310 }
 0x20c   :  { %v202_v47 = vmul.f32 %v1311_v46, %v1307_v37  ;;  %v199_v48 = vpop.xlane.xlu0 %198 }
 0x20d   :  { %1312 = vrcp.f32 %v199_v48 }
 0x20e   :  { %1206 = vmatmul.msk.f32.vlgmr.msra.gmra.mxu3 %vm181_vm2, %v202_v47 }
 0x20f   :  { %481 = vmatpush.msra.mxu3 %v1233_v32 }
 0x211   :  { %482 = vmatpush.msra.mxu3 %v1232_v33 }
 0x213   :  { %v1313_v49 = vpop.eup %1312 }
 0x214   :  { %v203_v50 = vmul.f32 %v1313_v49, %v1309_v40  ;;  %v1253_v40 = vld [vmem:[%s1795_s3 + $0x58] sm:$0xff] }
 0x216   :  { %1207 = vmatmul.msk.f32.vlgmr.msrb.gmra.mxu0 %vm181_vm2, %v203_v50  ;;  %1224 = vmatmul.msk.f32.vlgmr.msrb.gmra.mxu3 %vm42_vm0, %v1453_v8 }
 0x217   :  { %1228 = vmatpush.xpose.msk.msrb.mxu0 %vm126_vm1, %v305_v51  ;;  %592 = vmatpush.msrb.mxu3 %v1253_v40  ;;  %v1250_v51 = vld [vmem:[%s1795_s3 + $0x40] sm:$0xff]  ;;  %v1279_v40 = vld [vmem:[%s1795_s3 + $0x68] sm:$0xff] }
 0x219   :  { %593 = vmatpush.msrb.mxu3 %v1252_v41  ;;  %v1278_v41 = vld [vmem:[%s1795_s3 + $0x60] sm:$0xff] }
 0x21b   :  { %594 = vmatpush.msrb.mxu3 %v1251_v43 }
 0x21d   :  { %595 = vmatpush.msrb.mxu3 %v1250_v51 }
 0x21e   :  { %1227 = vmatmul.msk.f32.vlgmr.msra.gmra.mxu0 %vm126_vm1, %v274_v52  ;;  %1225 = vmatmul.msk.f32.gmra.mxu3 %vm42_vm0, %v1462_v9 }
 0x21f   :  { %510 = vmatpush.msra.mxu0 %v251_v53 }
 0x221   :  { %511 = vmatpush.msra.mxu0 %v250_v55 }
 0x226   :  { %1229 = vmatmul.msk.f32.vlgmr.msrb.gmra.mxu0 %vm126_vm1, %v277_v54 }
 0x291   :  { %v224_v57 = vpop.f32.mrf.mxu3 }
 0x292   :  { %1236 = vmatmul.msk.f32.vlgmr.msra.gmra.mxu0 %vm126_vm1, %v224_v57 }
 0x293   :  { %v247_v58 = vpop.f32.mrf.mxu0 }
 0x299   :  { %v330_v16 = vpop.f32.mrf.mxu3 }
 0x29a   :  { %1237 = vmatmul.msk.f32.gmra.mxu0 %vm126_vm1, %v247_v58  ;;  %430 = vmatpush.msra.mxu1 %v330_v16 }
 0x29b   :  { %v359_v59 = vpop.f32.mrf.mxu0 }
 0x29c   :  { %v388_v63 = vmul.f32 0.25, %v359_v59  ;;  %536 = vmatpush.msrb.mxu1 %v1241_v22 }
 0x29e   :  { %v390_v0 = vsel %vm181_vm2, %v388_v63, -inf  ;;  %537 = vmatpush.msrb.mxu1 %v1240_v23 }
 0x2a0   :  { %538 = vmatpush.msrb.mxu1 %v1239_v24 }
 0x2a1   :  { %v333_v17 = vpop.f32.mrf.mxu3 }
 0x2a2   :  { %453 = vmatpush.msra.mxu2 %v333_v17  ;;  %539 = vmatpush.msrb.mxu1 %v1238_v25 }
 0x2a3   :  { %v385_v60 = vpop.f32.mrf.mxu0 }
 0x2a4   :  { %v389_v61 = vmul.f32 0.25, %v385_v60  ;;  %564 = vmatpush.msrb.mxu2 %v1247_v18 }
 0x2a6   :  { %v393_v62 = vsel %vm181_vm2, %v389_v61, -inf  ;;  %565 = vmatpush.msrb.mxu2 %v1246_v19  ;;  %v1262_v19 = vld [vmem:[%s1796_s4 + $0x20] sm:$0xff] }
 0x2a7   :  { %394 = vmax.xlane.f32.xlu2 %v393_v62 }
 0x2a8   :  { %566 = vmatpush.msrb.mxu2 %v1245_v20 }
 0x2aa   :  { %567 = vmatpush.msrb.mxu2 %v1244_v21 }
 0x2af   :  { %391 = vmax.xlane.f32.xlu2 %v390_v0  ;;  %v1275_v0 = vld [vmem:[%s1794_s2 + $0x78] sm:$0xff] }
 0x30f   :  { %v1610_v42 = vpop.f32.mrf.mxu0 }
 0x317   :  { %v1615_v44 = vpop.f32.mrf.mxu0 }
 0x31a   :  { %v395_v4 = vpop.xlane.xlu2 %394 }
 0x31b   :  { %v397_v5 = vsub.f32 %v389_v61, %v395_v4  ;;  %v1273_v4 = vld [vmem:[%s1794_s2 + $0x68] sm:$0xff] }
 0x31d   :  { %v400_v6 = vmul.f32 1.442695, %v397_v5  ;;  %v1268_v5 = vld [vmem:[%s1793_s1 + $0x70] sm:$0xff] }
 0x31f   :  { %1314 = vpow2.f32 %v400_v6  ;;  %v1272_v6 = vld [vmem:[%s1794_s2 + $0x60] sm:$0xff] }
 0x322   :  { %v392_v7 = vpop.xlane.xlu2 %391 }
 0x323   :  { %v396_v10 = vsub.f32 %v388_v63, %v392_v7  ;;  %v1267_v7 = vld [vmem:[%s1793_s1 + $0x68] sm:$0xff] }
 0x325   :  { %v1315_v11 = vpop.eup %1314  ;;  %v398_v12 = vmul.f32 1.442695, %v396_v10 }
 0x326   :  { %v405_v13 = vsel %vm181_vm2, %v1315_v11, 0.0 }
 0x327   :  { %1316 = vpow2.f32 %v398_v12  ;;  %406 = vadd.xlane.f32.xlu0 %v405_v13  ;;  %v1263_v12 = vld [vmem:[%s1796_s4 + $0x28] sm:$0xff] }
 0x32d   :  { %v1317_v14 = vpop.eup %1316 }
 0x32e   :  { %v402_v15 = vsel %vm181_vm2, %v1317_v14, 0.0 }
 0x32f   :  { %403 = vadd.xlane.f32.xlu1 %v402_v15 }
 0x39a   :  { %v407_v26 = vpop.xlane.xlu0 %406 }
 0x39b   :  { %1318 = vrcp.f32 %v407_v26 }
 0x3a1   :  { %v1319_v27 = vpop.eup %1318 }
 0x3a2   :  { %v411_v28 = vmul.f32 %v1319_v27, %v1315_v11  ;;  %v404_v29 = vpop.xlane.xlu1 %403  ;;  %v1266_v11 = vld [vmem:[%s1793_s1 + $0x60] sm:$0xff] }
 0x3a3   :  { %1320 = vrcp.f32 %v404_v29 }
 0x3a4   :  { %1231 = vmatmul.msk.f32.vlgmr.msra.gmra.mxu2 %vm181_vm2, %v411_v28 }
 0x3a9   :  { %v1321_v30 = vpop.eup %1320 }
 0x3aa   :  { %v410_v31 = vmul.f32 %v1321_v30, %v1317_v14 }
 0x3ac   :  { %1230 = vmatmul.msk.f32.vlgmr.msra.gmra.mxu1 %vm181_vm2, %v410_v31  ;;  %1248 = vmatmul.msk.f32.vlgmr.msrb.gmra.mxu2 %vm42_vm0, %v1453_v8 }
 0x3b4   :  { %1249 = vmatmul.msk.f32.gmra.mxu2 %vm42_vm0, %v1462_v9  ;;  %1242 = vmatmul.msk.f32.vlgmr.msrb.gmra.mxu1 %vm42_vm0, %v1453_v8 }
 0x3bc   :  { %1243 = vmatmul.msk.f32.gmra.mxu1 %vm42_vm0, %v1462_v9 }
 0x427   :  { %v455_v34 = vpop.f32.mrf.mxu2 }
 0x429   :  { %v432_v35 = vpop.f32.mrf.mxu1 }
 0x42a   :  { %1234 = vmatmul.msk.f32.vlgmr.msra.gmra.mxu3 %vm126_vm1, %v432_v35 }
 0x42b   :  { %804 = vmatpush.msra.mxu3 %v1275_v0  ;;  %v1010_v0 = vld [vmem:[%s1798_s6 + $0x18] sm:$0xff] }
 0x42d   :  { %805 = vmatpush.msra.mxu3 %v1274_v2  ;;  %v1008_v2 = vld [vmem:[%s1798_s6 + $0x8] sm:$0xff] }
 0x42f   :  { %v569_v36 = vpop.f32.mrf.mxu2  ;;  %806 = vmatpush.msra.mxu3 %v1273_v4  ;;  %v1303_v4 = vld [vmem:[%s1797_s5] ss:$0 sm:$0xff] }
 0x430   :  { %1256 = vmatpush.xpose.msk.msrb.mxu0 %vm126_vm1, %v569_v36 }
 0x431   :  { %v541_v37 = vpop.f32.mrf.mxu1  ;;  %807 = vmatpush.msra.mxu3 %v1272_v6 }
 0x432   :  { %1235 = vmatmul.msk.f32.gmra.mxu3 %vm126_vm1, %v455_v34 }
 0x433   :  { %1257 = vmatmul.msk.f32.vlgmr.msrb.gmra.mxu0 %vm126_vm1, %v541_v37 }
 0x437   :  { %v572_v38 = vpop.f32.mrf.mxu2 }
 0x438   :  { %1258 = vmatpush.xpose.msk.msra.mxu1 %vm126_vm1, %v572_v38  ;;  %v1281_v38 = vld [vmem:[%s1795_s3 + $0x78] sm:$0xff] }
 0x439   :  { %v544_v39 = vpop.f32.mrf.mxu1 }
 0x43a   :  { %1254 = vmatmul.msk.f32.vlgmr.msrb.gmra.mxu3 %vm42_vm0, %v1453_v8 }
 0x43b   :  { %1259 = vmatmul.msk.f32.vlgmr.msra.gmra.mxu1 %vm126_vm1, %v544_v39  ;;  %v1280_v39 = vld [vmem:[%s1795_s3 + $0x70] sm:$0xff] }
 0x43c   :  { %748 = vmatpush.msrb.mxu1 %v1263_v12 }
 0x43e   :  { %749 = vmatpush.msrb.mxu1 %v1262_v19 }
 0x442   :  { %1255 = vmatmul.msk.f32.gmra.mxu3 %vm42_vm0, %v1462_v9 }
 0x44a   :  { %1276 = vmatmul.msk.f32.vlgmr.msra.gmra.mxu3 %vm42_vm0, %v1453_v8 }
 0x452   :  { %1277 = vmatmul.msk.f32.gmra.mxu3 %vm42_vm0, %v1462_v9 }
 0x4ad   :  { %v484_v62 = vpop.f32.mrf.mxu3 }
 0x4ae   :  { %v514_v26 = vadd.f32 %v1610_v42, %v484_v62 }
 0x4b0   :  { %v626_v45 = vpop.f32.mrf.mxu0 }
 0x4b1   :  { %v655_v46 = vmul.f32 0.25, %v626_v45 }
 0x4b3   :  { %v657_v47 = vsel %vm181_vm2, %v655_v46, -inf }
 0x4b4   :  { %658 = vmax.xlane.f32.xlu2 %v657_v47 }
 0x4b5   :  { %v487_v63 = vpop.f32.mrf.mxu3 }
 0x4b6   :  { %v517_v29 = vadd.f32 %v1615_v44, %v487_v63 }
 0x4b8   :  { %v652_v48 = vpop.f32.mrf.mxu1 }
 0x4b9   :  { %v656_v49 = vmul.f32 0.25, %v652_v48 }
 0x4bb   :  { %v660_v50 = vsel %vm181_vm2, %v656_v49, -inf }
 0x4bc   :  { %661 = vmax.xlane.f32.xlu0 %v660_v50 }
 0x4bd   :  { %v597_v1 = vpop.f32.mrf.mxu3 }
 0x4be   :  { %697 = vmatpush.msra.mxu2 %v597_v1  ;;  %v1009_v1 = vld [vmem:[%s1798_s6 + $0x10] sm:$0xff] }
 0x4c0   :  { %776 = vmatpush.msrb.mxu2 %v1269_v3  ;;  %v1007_v3 = vld [vmem:[%s1798_s6] sm:$0xff] }
 0x4c2   :  { %777 = vmatpush.msrb.mxu2 %v1268_v5 }
 0x4c4   :  { %778 = vmatpush.msrb.mxu2 %v1267_v7 }
 0x4c5   :  { %v600_v10 = vpop.f32.mrf.mxu3 }
 0x4c6   :  { %720 = vmatpush.msra.mxu0 %v600_v10  ;;  %779 = vmatpush.msrb.mxu2 %v1266_v11 }
 0x4c8   :  { %832 = vmatpush.msrb.mxu0 %v1281_v38 }
 0x4ca   :  { %833 = vmatpush.msrb.mxu0 %v1280_v39 }
 0x4cc   :  { %834 = vmatpush.msrb.mxu0 %v1279_v40  ;;  %v1134_v40 = vld [vmem:[%s1800_s8 + $0x10] sm:$0xff] }
 0x4cd   :  { %v809_v20 = vpop.f32.mrf.mxu3 }
 0x4ce   :  { %1284 = vmatpush.xpose.msk.msra.mxu1 %vm126_vm1, %v809_v20  ;;  %835 = vmatpush.msrb.mxu0 %v1278_v41 }
 0x4d5   :  { %v812_v21 = vpop.f32.mrf.mxu3 }
 0x527   :  { %v659_v52 = vpop.xlane.xlu2 %658 }
 0x528   :  { %v663_v53 = vsub.f32 %v655_v46, %v659_v52 }
 0x52a   :  { %v665_v54 = vmul.f32 1.442695, %v663_v53 }
 0x52c   :  { %1322 = vpow2.f32 %v665_v54  ;;  %v1291_v54 = vld [vmem:[%s1796_s4 + $0x38] sm:$0xff] }
 0x52f   :  { %v662_v55 = vpop.xlane.xlu0 %661 }
 0x530   :  { %v664_v56 = vsub.f32 %v656_v49, %v662_v55 }
 0x532   :  { %v1323_v57 = vpop.eup %1322  ;;  %v667_v58 = vmul.f32 1.442695, %v664_v56 }
 0x533   :  { %v669_v59 = vsel %vm181_vm2, %v1323_v57, 0.0 }
 0x534   :  { %1324 = vpow2.f32 %v667_v58  ;;  %670 = vadd.xlane.f32.xlu1 %v669_v59 }
 0x53a   :  { %v1325_v60 = vpop.eup %1324 }
 0x53b   :  { %v672_v61 = vsel %vm181_vm2, %v1325_v60, 0.0 }
 0x53c   :  { %673 = vadd.xlane.f32.xlu2 %v672_v61  ;;  %v1290_v61 = vld [vmem:[%s1796_s4 + $0x30] sm:$0xff]  ;;  %s1370_s4 = smov 8  }
 0x5a7   :  { %v671_v13 = vpop.xlane.xlu1 %670 }
 0x5a8   :  { %1326 = vrcp.f32 %v671_v13 }
 0x5ae   :  { %v1327_v14 = vpop.eup %1326 }
 0x5af   :  { %v677_v15 = vmul.f32 %v1327_v14, %v1323_v57  ;;  %v674_v16 = vpop.xlane.xlu2 %673 }
 0x5b0   :  { %1328 = vrcp.f32 %v674_v16 }
 0x5b1   :  { %1260 = vmatmul.msk.f32.vlgmr.msra.gmra.mxu2 %vm181_vm2, %v677_v15  ;;  %v1304_v15 = vld [vmem:[%s1799_s7] ss:$0 sm:$0xff] }
 0x5b2   :  { %1286 = vmatpush.xpose.msk.msra.mxu2 %vm126_vm1, %v812_v21 }
 0x5b6   :  { %v1329_v17 = vpop.eup %1328 }
 0x5b7   :  { %v678_v18 = vmul.f32 %v1329_v17, %v1325_v60 }
 0x5b9   :  { %1261 = vmatmul.msk.f32.vlgmr.msra.gmra.mxu0 %vm181_vm2, %v678_v18  ;;  %1270 = vmatmul.msk.f32.vlgmr.msrb.gmra.mxu2 %vm42_vm0, %v1453_v8 }
 0x5ba   :  { %1033 = vmatpush.msrb.mxu2 %v1010_v0 }
 0x5bc   :  { %1034 = vmatpush.msrb.mxu2 %v1009_v1 }
 0x5be   :  { %1035 = vmatpush.msrb.mxu2 %v1008_v2 }
 0x5c0   :  { %1036 = vmatpush.msrb.mxu2 %v1007_v3 }
 0x5c1   :  { %1271 = vmatmul.msk.f32.gmra.mxu2 %vm42_vm0, %v1462_v9  ;;  %1282 = vmatmul.msk.f32.vlgmr.msrb.gmra.mxu0 %vm42_vm0, %v1453_v8 }
 0x5c9   :  { %1283 = vmatmul.msk.f32.gmra.mxu0 %vm42_vm0, %v1462_v9 }
 0x634   :  { %v699_v22 = vpop.f32.mrf.mxu2 }
 0x635   :  { %1264 = vmatmul.msk.f32.vlgmr.msrb.gmra.mxu1 %vm126_vm1, %v699_v22 }
 0x636   :  { %v722_v23 = vpop.f32.mrf.mxu0  ;;  %988 = vmatpush.msrb.mxu1 %v1291_v54 }
 0x638   :  { %989 = vmatpush.msrb.mxu1 %v1290_v61 }
 0x63c   :  { %v781_v24 = vpop.f32.mrf.mxu2 }
 0x63d   :  { %1265 = vmatmul.msk.f32.gmra.mxu1 %vm126_vm1, %v722_v23 }
 0x63e   :  { %v837_v52 = vpop.f32.mrf.mxu0 }
 0x63f   :  { %937 = vmatpush.msra.mxu0 %v837_v52 }
 0x644   :  { %v784_v25 = vpop.f32.mrf.mxu2 }
 0x645   :  { %1285 = vmatmul.msk.f32.vlgmr.msra.gmra.mxu1 %vm126_vm1, %v781_v24  ;;  %1287 = vmatmul.msk.f32.vlgmr.msra.gmra.mxu2 %vm126_vm1, %v784_v25  ;;  %v1138_v24 = vld [vmem:[%s1800_s8 + $0x30] sm:$0xff] }
 0x646   :  { %v840_v53 = vpop.f32.mrf.mxu0 }
 0x647   :  { %960 = vmatpush.msrb.mxu0 %v840_v53 }
 0x6b2   :  { %v751_v27 = vpop.f32.mrf.mxu1 }
 0x6b3   :  { %v1675_v28 = vadd.f32 %v751_v27, %v514_v26 }
 0x6ba   :  { %v754_v30 = vpop.f32.mrf.mxu1 }
 0x6bb   :  { %v1678_v31 = vadd.f32 %v754_v30, %v517_v29 }
 0x6c2   :  { %v866_v32 = vpop.f32.mrf.mxu1 }
 0x6c3   :  { %v895_v33 = vmul.f32 0.25, %v866_v32  ;;  %v1136_v32 = vld [vmem:[%s1800_s8 + $0x20] sm:$0xff] }
 0x6c5   :  { %v897_v34 = vsel %vm181_vm2, %v895_v33, -inf }
 0x6c6   :  { %898 = vmax.xlane.f32.xlu0 %v897_v34 }
 0x6c8   :  { %v892_v35 = vpop.f32.mrf.mxu2 }
 0x6c9   :  { %v896_v36 = vmul.f32 0.25, %v892_v35 }
 0x6cb   :  { %v900_v37 = vsel %vm181_vm2, %v896_v36, -inf }
 0x6cc   :  { %901 = vmax.xlane.f32.xlu1 %v900_v37 }
 0x739   :  { %v899_v42 = vpop.xlane.xlu0 %898 }
 0x73a   :  { %v903_v43 = vsub.f32 %v895_v33, %v899_v42 }
 0x73c   :  { %v905_v44 = vmul.f32 1.442695, %v903_v43 }
 0x73e   :  { %1330 = vpow2.f32 %v905_v44 }
 0x73f   :  { %v902_v45 = vpop.xlane.xlu1 %901 }
 0x740   :  { %v904_v46 = vsub.f32 %v896_v36, %v902_v45  ;;  %v1135_v36 = vld [vmem:[%s1800_s8 + $0x18] sm:$0xff]  ;;  %v1133_v45 = vld [vmem:[%s1800_s8 + $0x8] sm:$0xff] }
 0x742   :  { %v907_v47 = vmul.f32 1.442695, %v904_v46 }
 0x744   :  { %v1331_v48 = vpop.eup %1330  ;;  %1332 = vpow2.f32 %v907_v47 }
 0x745   :  { %v909_v49 = vsel %vm181_vm2, %v1331_v48, 0.0 }
 0x746   :  { %910 = vadd.xlane.f32.xlu2 %v909_v49  ;;  %v1132_v49 = vld [vmem:[%s1800_s8] sm:$0xff] }
 0x74a   :  { %v1333_v50 = vpop.eup %1332 }
 0x74b   :  { %v912_v51 = vsel %vm181_vm2, %v1333_v50, 0.0 }
 0x74c   :  { %913 = vadd.xlane.f32.xlu0 %v912_v51 }
 0x7b9   :  { %v911_v55 = vpop.xlane.xlu2 %910 }
 0x7ba   :  { %1334 = vrcp.f32 %v911_v55 }
 0x7bf   :  { %v914_v56 = vpop.xlane.xlu0 %913 }
 0x7c0   :  { %v1335_v57 = vpop.eup %1334  ;;  %1336 = vrcp.f32 %v914_v56 }
 0x7c1   :  { %v917_v58 = vmul.f32 %v1335_v57, %v1331_v48 }
 0x7c3   :  { %1288 = vmatmul.msk.f32.vlgmr.msra.gmra.mxu0 %vm181_vm2, %v917_v58 }
 0x7c6   :  { %v1337_v59 = vpop.eup %1336 }
 0x7c7   :  { %v918_v60 = vmul.f32 %v1337_v59, %v1333_v50 }
 0x7cb   :  { %1289 = vmatmul.msk.f32.vlgmr.msrb.gmra.mxu0 %vm181_vm2, %v918_v60 }
 0x840   :  { %v939_v62 = vpop.f32.mrf.mxu0 }
 0x841   :  { %1292 = vmatmul.msk.f32.vlgmr.msrb.gmra.mxu1 %vm126_vm1, %v939_v62 }
 0x848   :  { %v962_v63 = vpop.f32.mrf.mxu0 }
 0x849   :  { %1293 = vmatmul.msk.f32.gmra.mxu1 %vm126_vm1, %v962_v63 }
 0x8be   :  { %v991_v5 = vpop.f32.mrf.mxu1 }
 0x8bf   :  { %v997_v6 = vadd.f32 %v991_v5, %v1675_v28  ;;  %v1137_v28 = vld [vmem:[%s1800_s8 + $0x28] sm:$0xff] }
 0x8c1   :  { %v1003_v7 = vadd.f32 %v1303_v4, %v997_v6 }
 0x8c3   :  { %v1727_v10 = vadd.f32 %v1003_v7, %v1453_v8 }
 0x8c5   :  { %1294 = vmatmul.msk.f32.vlgmr.msrb.gmra.mxu2 %vm42_vm0, %v1727_v10 }
 0x8c6   :  { %v994_v11 = vpop.f32.mrf.mxu1 }
 0x8c7   :  { %v998_v12 = vadd.f32 %v994_v11, %v1678_v31 }
 0x8c9   :  { %v1004_v13 = vadd.f32 %v1303_v4, %v998_v12 }
 0x8cb   :  { %v1733_v14 = vadd.f32 %v1004_v13, %v1462_v9  ;;  %v1139_v9 = vld [vmem:[%s1800_s8 + $0x38] sm:$0xff] }
 0x8cc   :  { %1159 = vmatpush.msrb.mxu3 %v1139_v9 }
 0x8cd   :  { %1295 = vmatmul.msk.f32.gmra.mxu2 %vm42_vm0, %v1733_v14 }
 0x8ce   :  { %1160 = vmatpush.msrb.mxu3 %v1138_v24 }
 0x8d0   :  { %1161 = vmatpush.msrb.mxu3 %v1137_v28 }
 0x8d2   :  { %1162 = vmatpush.msrb.mxu3 %v1136_v32 }
 0x8d4   :  { %1163 = vmatpush.msrb.mxu3 %v1135_v36 }
 0x8d6   :  { %1164 = vmatpush.msrb.mxu3 %v1134_v40 }
 0x8d8   :  { %1165 = vmatpush.msrb.mxu3 %v1133_v45 }
 0x8da   :  { %1166 = vmatpush.msrb.mxu3 %v1132_v49 }
 0x948   :  { %v1038_v16 = vpop.f32.mrf.mxu2 }
 0x949   :  { %v1740_v8 = vadd.f32 %v1304_v15, %v1038_v16 }
 0x94b   :  { %v1743_v17 = vmul.f32 0.70710677, %v1740_v8 }
 0x94d   :  { %v1048_v18 = vmul.f32 %v1743_v17, %v1743_v17 }
 0x94f   :  { %v1049_v19 = vmin.f32 %v1048_v18, 16.0 }
 0x950   :  { %v1041_v20 = vpop.f32.mrf.mxu2 }
 0x951   :  { %v1050_v21 = vmul.f32 2.1237322e-06, %v1049_v19  ;;  %v1061_v22 = vmul.f32 3.8918573e-05, %v1049_v19  ;;  %v1750_v23 = vadd.f32 %v1304_v15, %v1041_v20 }
 0x953   :  { %v1051_v25 = vadd.f32 0.00028619796, %v1050_v21  ;;  %v1062_v26 = vadd.f32 0.001143296, %v1061_v22  ;;  %v1756_v27 = vmul.f32 0.70710677, %v1750_v23 }
 0x955   :  { %v1052_v29 = vmul.f32 %v1051_v25, %v1049_v19  ;;  %v1063_v30 = vmul.f32 %v1062_v26, %v1049_v19  ;;  %v1088_v31 = vmul.f32 %v1756_v27, %v1756_v27 }
 0x957   :  { %v1064_v33 = vadd.f32 0.014752088, %v1063_v30  ;;  %v1053_v34 = vadd.f32 0.0036580483, %v1052_v29  ;;  %v1089_v35 = vmin.f32 %v1088_v31, 16.0 }
 0x959   :  { %v1065_v37 = vmul.f32 %v1064_v33, %v1049_v19  ;;  %v1090_v38 = vmul.f32 2.1237322e-06, %v1089_v35  ;;  %v1101_v39 = vmul.f32 3.8918573e-05, %v1089_v35  ;;  %v1054_v42 = vmul.f32 %v1053_v34, %v1049_v19 }
 0x95a   :  { %v1044_v33 = vmul.f32 0.5, %v1740_v8  ;;  %v1305_v8 = vld [vmem:[%s1801_s9] ss:$0 sm:$0xff]  ;;  %s1369_s9 = smov 128  }
 0x95b   :  { %v1066_v41 = vadd.f32 0.112945676, %v1065_v37  ;;  %v1091_v43 = vadd.f32 0.00028619796, %v1090_v38  ;;  %v1102_v44 = vadd.f32 0.001143296, %v1101_v39 }
 0x95c   :  { %v1055_v51 = vadd.f32 0.05243302, %v1054_v42  ;;  %v1045_v42 = vmul.f32 0.5, %v1750_v23 }
 0x95d   :  { %v1067_v46 = vmul.f32 %v1066_v41, %v1049_v19  ;;  %v1092_v47 = vmul.f32 %v1091_v43, %v1089_v35  ;;  %v1103_v48 = vmul.f32 %v1102_v44, %v1089_v35 }
 0x95e   :  { %v1056_v57 = vmul.f32 %v1055_v51, %v1049_v19 }
 0x95f   :  { %v1068_v50 = vadd.f32 0.4994258, %v1067_v46  ;;  %v1104_v52 = vadd.f32 0.014752088, %v1103_v48  ;;  %v1093_v54 = vadd.f32 0.0036580483, %v1092_v47 }
 0x960   :  { %v1057_v61 = vadd.f32 0.18741608, %v1056_v57 }
 0x961   :  { %v1069_v53 = vmul.f32 %v1068_v50, %v1049_v19  ;;  %v1105_v55 = vmul.f32 %v1104_v52, %v1089_v35  ;;  %v1094_v59 = vmul.f32 %v1093_v54, %v1089_v35 }
 0x962   :  { %v1058_v2 = vmul.f32 %v1057_v61, %v1049_v19 }
 0x963   :  { %v1070_v56 = vadd.f32 1.0, %v1069_v53  ;;  %v1106_v58 = vadd.f32 0.112945676, %v1105_v55  ;;  %v1095_v63 = vadd.f32 0.05243302, %v1094_v59 }
 0x964   :  { %v1059_v11 = vadd.f32 1.1283791, %v1058_v2 }
 0x965   :  { %1338 = vrcp.f32 %v1070_v56  ;;  %v1107_v60 = vmul.f32 %v1106_v58, %v1089_v35  ;;  %v1096_v5 = vmul.f32 %v1095_v63, %v1089_v35  ;;  %v1082_v7 = vand.u32 2147483648, %v1070_v56 }
 0x966   :  { %v1080_v13 = vand.u32 2147483647, %v1070_v56  ;;  %vm1076_vm4 = vweird.f32 %v1070_v56  ;;  %v1060_v9 = vmul.f32 %v1059_v11, %v1743_v17 }
 0x967   :  { %v1108_v62 = vadd.f32 0.4994258, %v1107_v60  ;;  %v1097_v15 = vadd.f32 0.18741608, %v1096_v5  ;;  %v1083_v18 = vor.u32 1.1754944e-38, %v1082_v7 }
 0x968   :  { %vm1081_vm6 = vcmp.eq.f32.partialorder %v1080_v13, 8.507059e+37 }
 0x969   :  { %v1109_v0 = vmul.f32 %v1108_v62, %v1089_v35  ;;  %v1098_v22 = vmul.f32 %v1097_v15, %v1089_v35 }
 0x96b   :  { %v1339_v1 = vpop.eup %1338  ;;  %v1110_v4 = vadd.f32 1.0, %v1109_v0  ;;  %v1099_v30 = vadd.f32 1.1283791, %v1098_v22 }
 0x96c   :  { %v1072_v3 = vmul.f32 %v1339_v1, %v1070_v56  ;;  %vm1077_vm3 = vweird.f32 %v1339_v1 }
 0x96d   :  { %1340 = vrcp.f32 %v1110_v4  ;;  %vm1078_vm5 = vmor %vm1076_vm4, %vm1077_vm3  ;;  %v1122_v29 = vand.u32 2147483648, %v1110_v4  ;;  %v1120_v32 = vand.u32 2147483647, %v1110_v4  ;;  %vm1116_vm8 = vweird.f32 %v1110_v4 }
 0x96e   :  { %v1073_v6 = vsub.f32 1.0, %v1072_v3  ;;  %v1100_v35 = vmul.f32 %v1099_v30, %v1756_v27 }
 0x96f   :  { %v1123_v37 = vor.u32 1.1754944e-38, %v1122_v29  ;;  %vm1121_vm11 = vcmp.eq.f32.partialorder %v1120_v32, 8.507059e+37 }
 0x970   :  { %v1074_v12 = vmul.f32 %v1339_v1, %v1073_v6 }
 0x972   :  { %v1075_v16 = vadd.f32 %v1339_v1, %v1074_v12 }
 0x973   :  { %v1341_v20 = vpop.eup %1340 }
 0x974   :  { %v1079_v21 = vsel %vm1078_vm5, %v1339_v1, %v1075_v16  ;;  %v1112_v24 = vmul.f32 %v1341_v20, %v1110_v4  ;;  %vm1117_vm7 = vweird.f32 %v1341_v20 }
 0x975   :  { %v1084_v19 = vsel %vm1081_vm6, %v1083_v18, %v1079_v21  ;;  %vm1118_vm10 = vmor %vm1116_vm8, %vm1117_vm7 }
 0x976   :  { %v1085_v25 = vmul.f32 %v1084_v19, %v1060_v9  ;;  %v1113_v26 = vsub.f32 1.0, %v1112_v24 }
 0x978   :  { %v1296_v28 = vclamps-f32 %v1085_v25, 1.0  ;;  %v1114_v31 = vmul.f32 %v1341_v20, %v1113_v26 }
 0x97a   :  { %v1128_v34 = vadd.f32 1.0, %v1296_v28  ;;  %v1115_v36 = vadd.f32 %v1341_v20, %v1114_v31 }
 0x97c   :  { %v1130_v17 = vmul.f32 %v1128_v34, %v1044_v33  ;;  %v1119_v38 = vsel %vm1118_vm10, %v1341_v20, %v1115_v36 }
 0x97d   :  { %v1124_v39 = vsel %vm1121_vm11, %v1123_v37, %v1119_v38 }
 0x97e   :  { %1298 = vmatmul.msk.f32.vlgmr.msrb.gmra.mxu3 %vm1144_vm9, %v1130_v17  ;;  %v1125_v40 = vmul.f32 %v1124_v39, %v1100_v35 }
 0x980   :  { %v1297_v41 = vclamps-f32 %v1125_v40, 1.0 }
 0x982   :  { %v1129_v43 = vadd.f32 1.0, %v1297_v41 }
 0x984   :  { %v1131_v44 = vmul.f32 %v1129_v43, %v1045_v42 }
 0x986   :  { %1299 = vmatmul.msk.f32.gmra.mxu3 %vm1144_vm9, %v1131_v44 }
 0xa01   :  { %v1168_v45 = vpop.f32.mrf.mxu3 }
 0xa02   :  { %v1169_v46 = vadd.f32 %v1305_v8, %v1168_v45 }
 0xa04   :  { %v1174_v47 = vadd.f32 %v1169_v46, %v1727_v10 }
 0xa06   :  { %1176 = vst.msk [vmem:[#allocation2] sm:$0xff] %vm42_vm0, %v1174_v47 }
 0xa09   :  { %v1171_v23 = vpop.f32.mrf.mxu3 }
 0xa0a   :  { %v1172_v27 = vadd.f32 %v1305_v8, %v1171_v23 }
 0xa0c   :  { %v1175_v48 = vadd.f32 %v1172_v27, %v1733_v14 }
 0xa0e   :  { %1177 = vst.msk [vmem:[#allocation2 + $0x8] sm:$0xff] %vm42_vm0, %v1175_v48 }
 0xa0f   :  { %1190 = dma.vmem_to_hbm [thread:$0]  %s1183_s23, 256, %s1185_s26, [#allocation3], %s1369_s9, %s1369_s9, %s1370_s4  }
 0xa10   :  { %1366 = dma.done.wait [#allocation3], 256  }
 0xa11   :  { %1367 = vsyncadd [#allocation3], 4294967040 }
 0xa12   :  { %1195 = vsyncpa [#allocation3], 1 }

</bundles_post_ra>
